<compile_context>
chip_gen: v7x
topology: tpu7x:2x2x1
jax: 0.10.0
libtpu: 0.0.40
codegen_flags: <defaults>
</compile_context>

<pallas_src>
import functools

import jax
import jax.numpy as jnp
from jax.experimental import pallas as pl
from jax.experimental.pallas import tpu as pltpu

# ----------------------------- configuration (opt) -----------------------------
LABEL_NC = 4              # opt.label_nc
CONTAIN_DONTCARE = False  # opt.contain_dontcare_label
NC = LABEL_NC + 1 if CONTAIN_DONTCARE else LABEL_NC
FEAT_C = 32               # correspondence feature channels
HIDDEN = 32               # generator hidden channels
CORR_TEMPERATURE = 10.0   # softmax sharpening of the correlation


# ----------------------------- Pallas kernels -----------------------------

def _ref_feat_kernel(lbl_lane_ref, lbl_sub_ref, fkc_ref, sem_ref, fk_ref, *, nc):
    # Prologue (runs once over the reference label map, O(HW) work):
    #   lbl_lane_ref: (1, 1, T) int32   lane-dense labels   -> ref_semantics (1, NC, T)
    #   lbl_sub_ref : (1, T, 1) int32   sublane labels      -> fk (1, T, C) bf16
    #   fkc_ref     : (NC, C) f32       per-class normalized key features
    lbl = lbl_lane_ref[0]                                                  # (1, T)
    cls = jax.lax.broadcasted_iota(jnp.int32, (nc,) + lbl.shape[1:], 0)    # (NC, T)
    sem_ref[0] = (lbl == cls).astype(jnp.float32)                          # lane-dense one-hot

    lbl_s = lbl_sub_ref[0]                                                 # (T, 1)
    cls_s = jax.lax.broadcasted_iota(jnp.int32, lbl_s.shape[:1] + (nc,), 1)
    oh_s = (lbl_s == cls_s).astype(jnp.float32)                            # (T, NC)
    fk = jnp.dot(oh_s, fkc_ref[...], preferred_element_type=jnp.float32)   # (T, C)
    fk_ref[0] = fk.astype(jnp.bfloat16)


def ref_features_pallas(lbl_lane, lbl_sub, fkc, *, tile):
    b, _, hw = lbl_lane.shape
    nc, c = fkc.shape
    return pl.pallas_call(
        functools.partial(_ref_feat_kernel, nc=nc),
        out_shape=(jax.ShapeDtypeStruct((b, nc, hw), jnp.float32),
                   jax.ShapeDtypeStruct((b, hw, c), jnp.bfloat16)),
        grid=(b, hw // tile),
        in_specs=[pl.BlockSpec((1, 1, tile), lambda i, j: (i, 0, j)),
                  pl.BlockSpec((1, tile, 1), lambda i, j: (i, j, 0)),
                  pl.BlockSpec((nc, c), lambda i, j: (0, 0))],
        out_specs=(pl.BlockSpec((1, nc, tile), lambda i, j: (i, 0, j)),
                   pl.BlockSpec((1, tile, c), lambda i, j: (i, j, 0))),
        compiler_params=pltpu.CompilerParams(
            dimension_semantics=("parallel", "parallel")),
    )(lbl_lane, lbl_sub, fkc)


def _corr_gen_kernel(lblq_ref, fk_ref, vaug_ref,
                     fqcT_ref, w1semT_ref, w1warpT_ref, b1T_ref, w2T_ref, b2T_ref,
                     warp_ref, fake_ref, sem_ref,
                     fq_sc, acc_sc, *, scale, nc):
    # Blocks (per grid point (b, qi, ki)):
    #   lblq_ref : (1, 1, TQ)  int32   query labels (lanes = query pixels)
    #   fk_ref   : (1, TK, C)  bf16    precomputed normalized key features
    #   vaug_ref : (1, 4, TK)  bf16    reference image tile + ones row (denominator fold)
    #   warp/fake: (1, 3, TQ)  f32     lane-dense outputs;  sem: (1, NC, TQ) f32
    ki = pl.program_id(2)

    @pl.when(ki == 0)
    def _init():
        lblq = lblq_ref[0]                                                 # (1, TQ)
        cls = jax.lax.broadcasted_iota(jnp.int32, (nc,) + lblq.shape[1:], 0)
        oh_qT = (lblq == cls).astype(jnp.float32)                          # (NC, TQ)
        sem_ref[0] = oh_qT                                                 # fused one-hot output
        # query features: per-class normalized features gathered via one-hot matmul,
        # cached once in bf16 for all key tiles of this query tile.
        fq_sc[...] = jnp.dot(fqcT_ref[...], oh_qT,
                             preferred_element_type=jnp.float32).astype(jnp.bfloat16)
        acc_sc[...] = jnp.zeros_like(acc_sc)

    # correlation scores (TK, TQ): bf16 MXU operands, f32 accumulation.
    s = jnp.dot(fk_ref[0], fq_sc[...], preferred_element_type=jnp.float32)  # (TK, TQ)

    # static-shift softmax: unit-normalized features => s in [-1, 1]; exp(scale*(s-1)) <= 1
    # so no running max / rescales are needed.  exp stays in f32 (v5e-safe); the bf16 cast
    # is needed for the MXU op anyway.
    p = jnp.exp((s - 1.0) * scale).astype(jnp.bfloat16)                     # (TK, TQ)

    # fused value matmul + denominator: row 3 of vaug is ones -> row 3 of acc is sum(p)
    acc_sc[...] += jnp.dot(vaug_ref[0], p, preferred_element_type=jnp.float32)  # (4, TQ)

    @pl.when(ki == pl.num_programs(2) - 1)
    def _finalize():
        acc = acc_sc[...]                                                   # (4, TQ)
        inv_l = pl.reciprocal(acc[3:4, :], approx=True)                     # (1, TQ)
        warpT = acc[0:3, :] * inv_l                                         # (3, TQ)
        warp_ref[0] = warpT
        # fused generator head; gen_in = cat([sem, warp, sem]) folded into
        # w1_sem = w1[:NC] + w1[NC+3:]  and  w1_warp = w1[NC:NC+3]
        oh_qT = sem_ref[0]                                                  # reuse resident one-hot
        hT = (jnp.dot(w1semT_ref[...], oh_qT, preferred_element_type=jnp.float32)
              + jnp.dot(w1warpT_ref[...], warpT, preferred_element_type=jnp.float32)
              + b1T_ref[...])
        hT = jnp.maximum(hT, 0.0)                                           # (HIDDEN, TQ)
        fake_ref[0] = jnp.tanh(jnp.dot(w2T_ref[...], hT, preferred_element_type=jnp.float32)
                               + b2T_ref[...])                              # (3, TQ)


def corr_gen_pallas(lbl_q, fk, vaug,
                    fqcT, w1semT, w1warpT, b1T, w2T, b2T,
                    *, scale, tq, tk):
    # lbl_q: (B, 1, HW) int32 ; fk: (B, HW, C) bf16 ; vaug: (B, 4, HW) bf16
    # returns warp (B, 3, HW) f32, fake (B, 3, HW) f32, input_semantics (B, NC, HW) f32
    b, _, hw = lbl_q.shape
    c, nc = fqcT.shape
    hidden = w1semT.shape[0]
    assert hw % tq == 0 and hw % tk == 0
    nq, nk = hw // tq, hw // tk

    kern = functools.partial(_corr_gen_kernel, scale=scale, nc=nc)
    warp, fake, sem = pl.pallas_call(
        kern,
        out_shape=(jax.ShapeDtypeStruct((b, 3, hw), jnp.float32),
                   jax.ShapeDtypeStruct((b, 3, hw), jnp.float32),
                   jax.ShapeDtypeStruct((b, nc, hw), jnp.float32)),
        grid=(b, nq, nk),
        in_specs=[
            pl.BlockSpec((1, 1, tq), lambda bi, qi, ki: (bi, 0, qi)),   # query labels
            pl.BlockSpec((1, tk, c), lambda bi, qi, ki: (bi, ki, 0)),   # key features (bf16)
            pl.BlockSpec((1, 4, tk), lambda bi, qi, ki: (bi, 0, ki)),   # ref image + ones (bf16)
            pl.BlockSpec((c, nc), lambda bi, qi, ki: (0, 0)),           # fqc^T
            pl.BlockSpec((hidden, nc), lambda bi, qi, ki: (0, 0)),      # w1_sem^T
            pl.BlockSpec((hidden, 3), lambda bi, qi, ki: (0, 0)),       # w1_warp^T
            pl.BlockSpec((hidden, 1), lambda bi, qi, ki: (0, 0)),       # b1^T
            pl.BlockSpec((3, hidden), lambda bi, qi, ki: (0, 0)),       # w2^T
            pl.BlockSpec((3, 1), lambda bi, qi, ki: (0, 0)),            # b2^T
        ],
        out_specs=(pl.BlockSpec((1, 3, tq), lambda bi, qi, ki: (bi, 0, qi)),
                   pl.BlockSpec((1, 3, tq), lambda bi, qi, ki: (bi, 0, qi)),
                   pl.BlockSpec((1, nc, tq), lambda bi, qi, ki: (bi, 0, qi))),
        scratch_shapes=[pltpu.VMEM((c, tq), jnp.bfloat16),   # cached normalized fq^T (bf16)
                        pltpu.VMEM((4, tq), jnp.float32)],   # [value acc (3 rows); denom (1 row)]
        compiler_params=pltpu.CompilerParams(
            dimension_semantics=("parallel", "parallel", "arbitrary"),
            # footprint is ~8 MiB at TQ=512/TK=1024; 32 MiB limit is safe on v5e/v6e/v7x.
            vmem_limit_bytes=32 * 1024 * 1024),
    )(lbl_q, fk, vaug, fqcT, w1semT, w1warpT, b1T, w2T, b2T)
    return warp, fake, sem


# ----------------------------- wrapper (forward, mode='inference') -----------------------------

def _pick_tile(hw, cap):
    t = min(cap, hw)
    for cand in range(t - t % 128, 0, -128):
        if hw % cand == 0:
            return cand
    return hw  # block == full extent is always legal


def _normalize_rows(w):
    w = w - jnp.mean(w, axis=-1, keepdims=True)
    return w * jax.lax.rsqrt(jnp.sum(w * w, axis=-1, keepdims=True) + 1e-6)


def init_params(key):
    k1, k2, k3, k4 = jax.random.split(key, 4)
    gen_in_c = 2 * NC + 3  # concat(input_semantics, warp_out, input_semantics)
    return {
        "wq": 0.1 * jax.random.normal(k1, (NC, FEAT_C), jnp.float32),
        "wk": 0.1 * jax.random.normal(k2, (NC, FEAT_C), jnp.float32),
        "w1": 0.1 * jax.random.normal(k3, (gen_in_c, HIDDEN), jnp.float32),
        "b1": jnp.zeros((1, HIDDEN), jnp.float32),
        "w2": 0.1 * jax.random.normal(k4, (HIDDEN, 3), jnp.float32),
        "b2": jnp.zeros((1, 3), jnp.float32),
    }


def pix2pix_forward(params, data, mode="inference", alpha=1.0, tq=None, tk=None):
    if mode != "inference":
        raise ValueError("|mode| is invalid")

    label = data["label"].astype(jnp.int32)          # (B, 1, H, W)
    label_ref = data["label_ref"].astype(jnp.int32)  # (B, 1, H, W)
    ref_image = data["ref"]                          # (B, 3, H, W)
    self_ref = data["self_ref"]                      # (B, 3, H, W)

    b, _, h, w = label.shape
    hw = h * w
    tq = tq or _pick_tile(hw, 512)
    tk = tk or _pick_tile(hw, 1024)
    tr = _pick_tile(hw, 512)

    scale = float(alpha) * CORR_TEMPERATURE
    # static-shift softmax relies on unit-normalized features & bounded scale
    assert scale <= 30.0, "static-shift softmax requires alpha * temperature <= 30"

    # NCHW tensors flatten directly to (C, HW) lane-dense layout -- no transposes.
    # (B,1,HW) and (B,HW,1) share the same row-major order, so both are free reshapes.
    lbl_q_lane = label.reshape(b, 1, hw)
    lbl_r_lane = label_ref.reshape(b, 1, hw)
    lbl_r_sub = label_ref.reshape(b, hw, 1)
    ref_chw = ref_image.reshape(b, 3, hw)
    # reference image augmented with a ones row so the value matmul also produces sum(p)
    vaug = jnp.concatenate(
        [ref_chw, jnp.ones((b, 1, hw), ref_chw.dtype)], axis=1).astype(jnp.bfloat16)

    # per-class normalized correspondence features (tiny NCxC work, done once);
    # per-pixel features are exactly the per-class rows picked by the one-hot.
    fqc = _normalize_rows(params["wq"])              # (NC, C)
    fkc = _normalize_rows(params["wk"])              # (NC, C)

    # prologue: ref one-hot semantics + hoisted, normalized bf16 key features (B, HW, C)
    ref_semantics, fk = ref_features_pallas(lbl_r_lane, lbl_r_sub, fkc, tile=tr)

    # fold the duplicated semantics out of the generator's first layer
    # (gen_in = cat([sem, warp, sem]) -> w1_sem = w1[:NC] + w1[NC+3:], w1_warp = w1[NC:NC+3])
    w1 = params["w1"]
    w1semT = (w1[:NC] + w1[NC + 3:]).T               # (HIDDEN, NC)
    w1warpT = w1[NC:NC + 3].T                        # (HIDDEN, 3)
    b1T = params["b1"].T                             # (HIDDEN, 1)
    w2T = params["w2"].T                             # (3, HIDDEN)
    b2T = params["b2"].T                             # (3, 1)

    # netCorr (flash-style softmax warp) + netG (fused 1x1-conv head) + query one-hot,
    # all in one kernel
    warp_chw, fake_chw, input_semantics = corr_gen_pallas(
        lbl_q_lane, fk, vaug,
        fqc.T, w1semT, w1warpT, b1T, w2T, b2T,
        scale=scale, tq=tq, tk=tk)

    return {
        "fake_image": fake_chw.reshape(b, 3, h, w),
        "warp_out": warp_chw.reshape(b, 3, h, w),
        "input_semantics": input_semantics.reshape(b, NC, h, w),
        "ref_semantics": ref_semantics.reshape(b, NC, h, w),
        "self_ref": self_ref,
    }


# ----------------------------- pure-JAX reference (for correctness check) -----------------------------

def reference_forward(params, data, alpha=1.0):
    label = data["label"].astype(jnp.int32)
    label_ref = data["label_ref"].astype(jnp.int32)
    b, _, h, w = label.shape
    hw = h * w
    sem_in = jax.nn.one_hot(label.reshape(b, hw), NC, dtype=jnp.float32)   # (B,HW,NC)
    sem_rf = jax.nn.one_hot(label_ref.reshape(b, hw), NC, dtype=jnp.float32)
    ref_flat = data["ref"].reshape(b, 3, hw).transpose(0, 2, 1)            # (B,HW,3)

    fq = _normalize_rows(sem_in @ params["wq"])
    fk = _normalize_rows(sem_rf @ params["wk"])

    corr = jnp.einsum("bqc,bkc->bqk",
                      fq.astype(jnp.bfloat16), fk.astype(jnp.bfloat16),
                      preferred_element_type=jnp.float32) * (alpha * CORR_TEMPERATURE)
    attn = jax.nn.softmax(corr, axis=-1)
    warp = jnp.einsum("bqk,bkc->bqc", attn, ref_flat)

    gen_in = jnp.concatenate([sem_in, warp, sem_in], axis=-1)
    hmid = jnp.maximum(gen_in @ params["w1"] + params["b1"], 0.0)
    fake = jnp.tanh(hmid @ params["w2"] + params["b2"])

    to_nchw = lambda x: x.reshape(b, h, w, -1).transpose(0, 3, 1, 2)
    return {
        "fake_image": to_nchw(fake),
        "warp_out": to_nchw(warp),
        "input_semantics": to_nchw(sem_in),
        "ref_semantics": to_nchw(sem_rf),
    }


# ----------------------------- main -----------------------------

if __name__ == "__main__":
    B, H, W = 2, 16, 16
    key = jax.random.PRNGKey(0)
    kp, kl, klr, kr = jax.random.split(key, 4)

    params = init_params(kp)

    data = {
        "label": jax.random.randint(kl, (B, 1, H, W), 0, NC, dtype=jnp.int32),
        "label_ref": jax.random.randint(klr, (B, 1, H, W), 0, NC, dtype=jnp.int32),
        "ref": jax.random.normal(kr, (B, 3, H, W), jnp.float32),
        "self_ref": jnp.zeros((B, 3, H, W), jnp.float32),
        "image": jnp.zeros((B, 3, H, W), jnp.float32),  # unused at inference
        "path": None,                                   # unused
    }

    # small tiles so the (b, q, k) grid, the ki==0 init and finalize branches,
    # and the denominator-folded accumulation are all exercised
    out = pix2pix_forward(params, data, mode="inference", alpha=1.0, tq=128, tk=128)
    jax.block_until_ready(out["fake_image"])
    jax.block_until_ready(out["warp_out"])

    assert out["fake_image"].shape == (B, 3, H, W)
    assert out["warp_out"].shape == (B, 3, H, W)
    assert out["input_semantics"].shape == (B, NC, H, W)
    assert out["ref_semantics"].shape == (B, NC, H, W)

    ref = reference_forward(params, data, alpha=1.0)
    for name in ["input_semantics", "ref_semantics", "warp_out", "fake_image"]:
        err = float(jnp.max(jnp.abs(out[name] - ref[name])))
        assert err < 2e-2, (name, err)

    print("KERNEL_OK")
</pallas_src>

<mosaic_0001>
module attributes {stable_mosaic.version = 11 : i64} {
  func.func @_ref_feat_kernel(%arg0: i32, %arg1: i32, %arg2: memref<1x1x256xi32, #tpu.memory_space<vmem>>, %arg3: memref<1x256x1xi32, #tpu.memory_space<vmem>>, %arg4: memref<4x32xf32, #tpu.memory_space<vmem>>, %arg5: memref<1x4x256xf32, #tpu.memory_space<vmem>>, %arg6: memref<1x256x32xbf16, #tpu.memory_space<vmem>>) attributes {dimension_semantics = [#tpu.dimension_semantics<parallel>, #tpu.dimension_semantics<parallel>], iteration_bounds = array<i64: 2, 1>, scalar_prefetch = 0 : i64, scratch_operands = 0 : i64, tpu.core_type = #tpu.core_type<tc>, window_params = [{transform_indices = @transform_0, window_bounds = array<i64: 1, 1, 256>}, {transform_indices = @transform_1, window_bounds = array<i64: 1, 256, 1>}, {pipeline_mode = #tpu.pipeline_mode<synchronous>, transform_indices = @transform_2, window_bounds = array<i64: 4, 32>}, {transform_indices = @transform_3, window_bounds = array<i64: 1, 4, 256>}, {transform_indices = @transform_4, window_bounds = array<i64: 1, 256, 32>}]} {
    %c0 = arith.constant 0 : index
    %c0_0 = arith.constant 0 : index
    %c0_1 = arith.constant 0 : index
    %0 = vector.load %arg2[%c0, %c0_0, %c0_1] : memref<1x1x256xi32, #tpu.memory_space<vmem>>, vector<1x1x256xi32>
    %1 = vector.shape_cast %0 : vector<1x1x256xi32> to vector<1x256xi32>
    %2 = tpu.iota {dimensions = array<i32: 0>} : vector<4x256xi32>
    %3 = vector.broadcast %1 : vector<1x256xi32> to vector<4x256xi32>
    %4 = arith.cmpi eq, %3, %2 : vector<4x256xi32>
    %5 = arith.extui %4 : vector<4x256xi1> to vector<4x256xi32>
    %6 = arith.sitofp %5 : vector<4x256xi32> to vector<4x256xf32>
    %c0_2 = arith.constant 0 : index
    %c0_3 = arith.constant 0 : index
    %c0_4 = arith.constant 0 : index
    %7 = vector.load %arg5[%c0_2, %c0_3, %c0_4] : memref<1x4x256xf32, #tpu.memory_space<vmem>>, vector<1x4x256xf32>
    %8 = vector.shape_cast %7 : vector<1x4x256xf32> to vector<4x256xf32>
    %9 = vector.shape_cast %6 : vector<4x256xf32> to vector<1x4x256xf32>
    tpu.vector_store %arg5[%c0_2, %c0_3, %c0_4], %9 {strides = array<i32>} : memref<1x4x256xf32, #tpu.memory_space<vmem>>, vector<1x4x256xf32>,
    %c0_5 = arith.constant 0 : index
    %c0_6 = arith.constant 0 : index
    %c0_7 = arith.constant 0 : index
    %10 = vector.load %arg3[%c0_5, %c0_6, %c0_7] : memref<1x256x1xi32, #tpu.memory_space<vmem>>, vector<1x256x1xi32>
    %11 = vector.shape_cast %10 : vector<1x256x1xi32> to vector<256x1xi32>
    %12 = tpu.iota {dimensions = array<i32: 1>} : vector<256x4xi32>
    %13 = vector.broadcast %11 : vector<256x1xi32> to vector<256x4xi32>
    %14 = arith.cmpi eq, %13, %12 : vector<256x4xi32>
    %15 = arith.extui %14 : vector<256x4xi1> to vector<256x4xi32>
    %16 = arith.sitofp %15 : vector<256x4xi32> to vector<256x4xf32>
    %c0_8 = arith.constant 0 : index
    %c0_9 = arith.constant 0 : index
    %17 = vector.load %arg4[%c0_8, %c0_9] : memref<4x32xf32, #tpu.memory_space<vmem>>, vector<4x32xf32>
    %cst = arith.constant dense<0.000000e+00> : vector<256x32xf32>
    %18 = tpu.matmul %16, %17, %cst {dimension_numbers = #tpu.dot_dimension_numbers<[1], [0], [0], [1], [0, 0, 1, 1], [], []>} : vector<256x4xf32>, vector<4x32xf32>, vector<256x32xf32> -> vector<256x32xf32>
    %19 = arith.truncf %18 : vector<256x32xf32> to vector<256x32xbf16>
    %c0_10 = arith.constant 0 : index
    %c0_11 = arith.constant 0 : index
    %c0_12 = arith.constant 0 : index
    %20 = vector.load %arg6[%c0_10, %c0_11, %c0_12] : memref<1x256x32xbf16, #tpu.memory_space<vmem>>, vector<1x256x32xbf16>
    %21 = vector.shape_cast %20 : vector<1x256x32xbf16> to vector<256x32xbf16>
    %22 = vector.shape_cast %19 : vector<256x32xbf16> to vector<1x256x32xbf16>
    tpu.vector_store %arg6[%c0_10, %c0_11, %c0_12], %22 {strides = array<i32>} : memref<1x256x32xbf16, #tpu.memory_space<vmem>>, vector<1x256x32xbf16>,
    return
  }
  func.func @transform_0(%arg0: i32, %arg1: i32) -> (i32, i32, i32) {
    %c0_i32 = arith.constant 0 : i32
    %c0_i32_0 = arith.constant 0 : i32
    return %arg0, %c0_i32, %arg1 : i32, i32, i32
  }
  func.func @transform_1(%arg0: i32, %arg1: i32) -> (i32, i32, i32) {
    %c0_i32 = arith.constant 0 : i32
    %c0_i32_0 = arith.constant 0 : i32
    return %arg0, %arg1, %c0_i32 : i32, i32, i32
  }
  func.func @transform_2(%arg0: i32, %arg1: i32) -> (i32, i32) {
    %c0_i32 = arith.constant 0 : i32
    %c0_i32_0 = arith.constant 0 : i32
    %c0_i32_1 = arith.constant 0 : i32
    return %c0_i32, %c0_i32_0 : i32, i32
  }
  func.func @transform_3(%arg0: i32, %arg1: i32) -> (i32, i32, i32) {
    %c0_i32 = arith.constant 0 : i32
    %c0_i32_0 = arith.constant 0 : i32
    return %arg0, %c0_i32, %arg1 : i32, i32, i32
  }
  func.func @transform_4(%arg0: i32, %arg1: i32) -> (i32, i32, i32) {
    %c0_i32 = arith.constant 0 : i32
    %c0_i32_0 = arith.constant 0 : i32
    return %arg0, %arg1, %c0_i32 : i32, i32, i32
  }
}

</mosaic_0001>

<bundles_post_ra>
// kernel: tpu_custom_call.1
= control target key start
LH: loop header
LB: loop body
LE: loop exit
PB: predicated region body
PF: predicated region fallthrough
CT: control target
= control target key end

     0   :  { %10 = vsyncpa [#allocation3], 0  ;;  %s1902_s0 = inlined_call_operand.vmem [shape: s32[2,1,256], index: 0, kind: input, shape index: {}]   ;;  %s1903_s1 = inlined_call_operand.vmem [shape: s32[2,256,1], index: 1, kind: input, shape index: {}]   ;;  %s1904_s2 = inlined_call_operand.vmem [shape: f32[4,32], index: 2, kind: input, shape index: {}]   ;;  %s1905_s3 = inlined_call_operand.hbm [shape: f32[2,4,256], index: 3, kind: output, shape index: {0}]   ;;  %s1906_s4 = inlined_call_operand.vmem [shape: bf16[2,256,32], index: 4, kind: output, shape index: {1}]  }
   0x1   :  { %12 = vsyncpa [#allocation3 + $0x1], 0  ;;  %s1580_s15 = smov 0   ;;  %s1582_s16 = smov 0  }
   0x2   :  { %s1584_s17 = smov 0   ;;  %s1586_s18 = smov 0  }
   0x3   :  { %s1588_s19 = smov 0   ;;  %s1590_s20 = smov 0  }
   0x4 LB: > { %s1178_s21 = sadd.s32 4294967295, %s1550_s20   ;;  %s1179_s22 = sadd.s32 4294967294, %s1550_s20   ;;  %s1550_s20 = sphi %s1590_s20, %s18_s20   ;;  %s1546_s19 = sphi %s1588_s19, %s1913_s19   ;;  %s1542_s18 = sphi %s1586_s18, %s1912_s18   ;;  %s1538_s17 = sphi %s1584_s17, %s1911_s17   ;;  %s1534_s16 = sphi %s1582_s16, %s1910_s16   ;;  %s1530_s15 = sphi %s1580_s15, %s1909_s15  }
   0x5   : > { %s30_s23 = sadd.s32 1, %s1546_s19  ;;  %s116_s24 = sadd.s32 1, %s1538_s17 }
   0x6   : > { %p32_p0 = scmp.ge.s32.totalorder %s30_s23, 2  ;;  %p126_p1 = scmp.ne.s32.totalorder %s1538_s17, %s1534_s16 }
   0x7   : > { %p127_p2 = scmp.eq.s32.totalorder %s1178_s21, 1  ;;  %p132_p3 = scmp.ne.s32.totalorder %s1534_s16, %s1530_s15 }
   0x8   : > { %s1915_s23 = smov (%p32_p0, %s30_s23), 0  ;;  %p133_p5 = scmp.eq.s32.totalorder %s1179_s22, 1 }
   0x9   : > { %p1620_p4 = por %p127_p2, %p126_p1  ;;  %s111_s26 = ssub.s32 %s1546_s19, %s1915_s23 }
   0xa   : > { %p1182_p6 = scmp.ge.s32.totalorder %s1550_s20, 1  ;;  %p114_p7 = scmp.eq.s32.totalorder %s111_s26, 0 }
   0xb   : > { %p1627_p8 = por %p133_p5, %p132_p3  ;;  %p207_p9 = scmp.lt.s32.totalorder %s1550_s20, 3 }
   0xc   : > { %s1633_s28 = scalar_select %p114_p7, %s1538_s17, %s116_s24  }
   0xd   : > { %p208_p10 = pnand %p1182_p6, %p207_p9 }
   0xe   : > { %p255_p11 = scmp.lt.s32.totalorder (!%p208_p10), %s1542_s18, 1  ;;  %v1552_v0 = vmov (!%p208_p10), 0   ;;  %vm630_vm0 = vcmask (!%p208_p10), 1043456   ;;  %v532_v9 = vld [vmem:[%s1904_s2] sm:$0xf] (!%p208_p10)  ;;  %v285_v34 = vlaneseq (!%p208_p10)  ;;  %vm533_vm1 = vcmask (!%p208_p10), 31744  }
   0xf   : > { %211 = sbr.rel (%p208_p10) target bundleno = 433 (0x1b1), region = 32  ;;  %1471 = vset.pattern.permute.xlu1 (!%p208_p10), %v1552_v0  ;;  %1470 = vset.pattern.permute.xlu0 (!%p208_p10), %v1552_v0  ;;  %v1553_v38 = vmov (!%p208_p10), 0.0   ;;  %s240_s14 = sand.u32 (!%p208_p10), 1, %s1534_s16  }
  0x10   : > { %1361 = vmatprep.subr.msk.mxu0 (!%p208_p10), %vm630_vm0, %v532_v9  ;;  %1411 = vmatprep.subr.msk.mxu1 (!%p208_p10), %vm630_vm0, %v532_v9  ;;  %v1681_v35 = vand.u32 (!%p208_p10), 127, %v285_v34  ;;  %s1183_s21 = sshll.u32 (!%p208_p10), %s240_s14, 3  ;;  %s1327_s22 = sshll.u32 (!%p208_p10), %s1542_s18, 7 }
  0x11   : > { %1362 = vmatpush3.msk.msra.mxu0 (!%p208_p10), %vm630_vm0, %v532_v9  ;;  %1412 = vmatpush3.msk.msra.mxu1 (!%p208_p10), %vm630_vm0, %v532_v9  ;;  %s242_s24 = scalar_lea.vmem (!%p208_p10), [#allocation2], %s1183_s21  ;;  %s1791_s6 = scalar_lea.hbm (!%p208_p10), %s1905_s3, %s1327_s22 }
  0x12   : > { %s1046_s26 = sshll.u32 (!%p208_p10), %s242_s24, 4  ;;  %s1554_s9 = smov (!%p208_p10), [#allocation2]   ;;  %s1047_s26 = int_to_ptr.vmem [resolvable:$true] %s1046_s26 }
  0x13   : > { %s1472_s8 = scalar_lea.vmem (!%p208_p10), %s1047_s26, 128 }
  0x14   : > { %p1473_p12 = scmp.ne.s32.totalorder (!%p208_p10), %s1047_s26, %s1472_s8 }
  0x16   : > { %s1637_s29 = scalar_select %p255_p11, %s1542_s18, 1 }
  0x17   : > { %p1474_p13 = pnand %p1473_p12, %p1620_p4 }
  0x18   : > { %s1293_s30 = sshll.u32 %s1637_s29, 8  ;;  %s1184_s10 = sshll.u32 %s1637_s29, 1 }
  0x19   : > { %s1643_s7 = scalar_lea.vmem %s1903_s1, %s1293_s30  ;;  %s261_s13 = scalar_lea.vmem %s1902_s0, %s1184_s10 }
  0x1a   : > { %v307_v1 = vld [vmem:[%s1643_s7 + $0x8] sm:$0xff]  ;;  %v306_v2 = vld [vmem:[%s1643_s7] sm:$0xff]  ;;  %v324_v5 = vld [vmem:[%s1643_s7 + $0x90] sm:$0xff]  ;;  %p1475_p0 = pneg %p1474_p13  ;;  %s1476_s10 = sshll.u32 %s1554_s9, 4  ;;  %s1477_s10 = int_to_ptr.vmem [resolvable:$false] %s1476_s10 }
  0x1b   : > { %344 = vperm.xlu1 %1471, %v307_v1   ;;  %341 = vperm.xlu0 %1470, %v306_v2   ;;  %v323_v3 = vld [vmem:[%s1643_s7 + $0x88] sm:$0xff]  ;;  %v322_v4 = vld [vmem:[%s1643_s7 + $0x80] sm:$0xff]  ;;  %v308_v6 = vld [vmem:[%s1643_s7 + $0x10] sm:$0xff]  ;;  %s1478_s11 = scalar_lea.vmem %s1477_s10, 256  ;;  %p1479_p1 = scmp.lt.s32.totalorder %s1047_s26, %s1477_s10 }
  0x1c   : > { %v325_v7 = vld [vmem:[%s1643_s7 + $0x98] sm:$0xff]  ;;  %v326_v10 = vld [vmem:[%s1643_s7 + $0xa0] sm:$0xff]  ;;  %v327_v12 = vld [vmem:[%s1643_s7 + $0xa8] sm:$0xff]  ;;  %p1480_p2 = scmp.lt.s32.totalorder %s1478_s11, %s1472_s8 }
  0x1d   : > { %v309_v8 = vld [vmem:[%s1643_s7 + $0x18] sm:$0xff]  ;;  %v310_v11 = vld [vmem:[%s1643_s7 + $0x20] sm:$0xff]  ;;  %v311_v13 = vld [vmem:[%s1643_s7 + $0x28] sm:$0xff] }
  0x1e   : > { %v328_v14 = vld [vmem:[%s1643_s7 + $0xb0] sm:$0xff]  ;;  %v329_v16 = vld [vmem:[%s1643_s7 + $0xb8] sm:$0xff]  ;;  %v330_v18 = vld [vmem:[%s1643_s7 + $0xc0] sm:$0xff]  ;;  %p1481_p3 = por %p1480_p2, %p1479_p1 }
  0x1f   : > { %392 = vperm.xlu1 %1471, %v323_v3   ;;  %389 = vperm.xlu0 %1470, %v322_v4   ;;  %v312_v15 = vld [vmem:[%s1643_s7 + $0x30] sm:$0xff]  ;;  %v313_v17 = vld [vmem:[%s1643_s7 + $0x38] sm:$0xff]  ;;  %v314_v19 = vld [vmem:[%s1643_s7 + $0x40] sm:$0xff] }
  0x20   : > { %v331_v20 = vld [vmem:[%s1643_s7 + $0xc8] sm:$0xff]  ;;  %v332_v22 = vld [vmem:[%s1643_s7 + $0xd0] sm:$0xff]  ;;  %v333_v24 = vld [vmem:[%s1643_s7 + $0xd8] sm:$0xff]  ;;  %p1482_p5 = pnand %p1481_p3, %p1475_p0 }
  0x21   : > { %v315_v21 = vld [vmem:[%s1643_s7 + $0x48] sm:$0xff]  ;;  %v316_v23 = vld [vmem:[%s1643_s7 + $0x50] sm:$0xff]  ;;  %v317_v25 = vld [vmem:[%s1643_s7 + $0x58] sm:$0xff] }
  0x22   : > { %v334_v26 = vld [vmem:[%s1643_s7 + $0xe0] sm:$0xff]  ;;  %v335_v28 = vld [vmem:[%s1643_s7 + $0xe8] sm:$0xff]  ;;  %v336_v30 = vld [vmem:[%s1643_s7 + $0xf0] sm:$0xff] }
  0x23   : > { %395 = vperm.xlu1 %1471, %v324_v5   ;;  %347 = vperm.xlu0 %1470, %v308_v6   ;;  %v318_v27 = vld [vmem:[%s1643_s7 + $0x60] sm:$0xff]  ;;  %v319_v29 = vld [vmem:[%s1643_s7 + $0x68] sm:$0xff]  ;;  %v320_v31 = vld [vmem:[%s1643_s7 + $0x70] sm:$0xff] }
  0x24   : > { %v337_v32 = vld [vmem:[%s1643_s7 + $0xf8] sm:$0xff] }
  0x25   : > { %v321_v33 = vld [vmem:[%s1643_s7 + $0x78] sm:$0xff]  ;;  %s1021_s7 = scalar_lea.sflag [#allocation3], %s240_s14 }
  0x27   : > { %398 = vperm.xlu1 %1471, %v325_v7   ;;  %350 = vperm.xlu0 %1470, %v309_v8  }
  0x2b   : > { %401 = vperm.xlu1 %1471, %v326_v10   ;;  %353 = vperm.xlu0 %1470, %v310_v11  }
  0x2f   : > { %404 = vperm.xlu1 %1471, %v327_v12   ;;  %356 = vperm.xlu0 %1470, %v311_v13  }
  0x33   : > { %407 = vperm.xlu1 %1471, %v328_v14   ;;  %359 = vperm.xlu0 %1470, %v312_v15  }
  0x37   : > { %410 = vperm.xlu1 %1471, %v329_v16   ;;  %362 = vperm.xlu0 %1470, %v313_v17  }
  0x3b   : > { %413 = vperm.xlu1 %1471, %v330_v18   ;;  %365 = vperm.xlu0 %1470, %v314_v19  }
  0x3f   : > { %416 = vperm.xlu1 %1471, %v331_v20   ;;  %368 = vperm.xlu0 %1470, %v315_v21  }
  0x43   : > { %419 = vperm.xlu1 %1471, %v332_v22   ;;  %371 = vperm.xlu0 %1470, %v316_v23  }
  0x47   : > { %422 = vperm.xlu1 %1471, %v333_v24   ;;  %374 = vperm.xlu0 %1470, %v317_v25  }
  0x4b   : > { %425 = vperm.xlu1 %1471, %v334_v26   ;;  %377 = vperm.xlu0 %1470, %v318_v27  }
  0x4f   : > { %428 = vperm.xlu1 %1471, %v335_v28   ;;  %380 = vperm.xlu0 %1470, %v319_v29  }
  0x53   : > { %431 = vperm.xlu1 %1471, %v336_v30   ;;  %383 = vperm.xlu0 %1470, %v320_v31  }
  0x57   : > { %434 = vperm.xlu1 %1471, %v337_v32   ;;  %386 = vperm.xlu0 %1470, %v321_v33  }
  0x9a   : > { %v345_v36 = vpop.permute.xlu1 %344  ;;  %v342_v37 = vpop.permute.xlu0 %341 }
  0x9b   : > { %vm437_vm2 = vcmp.eq.s32.totalorder %v345_v36, %v1681_v35  ;;  %vm436_vm3 = vcmp.eq.s32.totalorder %v342_v37, %v1681_v35 }
  0x9c   : > { %v1192_v39 = vsel %vm437_vm2, 1.0, %v1553_v38  ;;  %v1191_v40 = vsel %vm436_vm3, 1.0, %v1553_v38 }
  0x9d   : > { %1363 = vmatprep.mubr.msk.f32.mxu0 %vm533_vm1, %v1191_v40  ;;  %v286_v40 = vshrl.u32 %v285_v34, 7 }
  0x9e   : > { %v393_v41 = vpop.permute.xlu1 %392  ;;  %1364 = vmatmul.mubr.msk.f32.vlgmr.msra.gmra.mrb[0].mxu0 %vm533_vm1, %v1192_v39  ;;  %v390_v42 = vpop.permute.xlu0 %389 }
  0x9f   : > { %vm453_vm4 = vcmp.eq.s32.totalorder %v393_v41, %v1681_v35  ;;  %vm452_vm5 = vcmp.eq.s32.totalorder %v390_v42, %v1681_v35  ;;  %v289_v41 = vsub.s32 0, %v286_v40  ;;  %v293_v42 = vsub.s32 1, %v286_v40 }
  0xa0   : > { %v1208_v43 = vsel %vm453_vm4, 1.0, %v1553_v38  ;;  %v1207_v44 = vsel %vm452_vm5, 1.0, %v1553_v38 }
  0xa1   : > { %1387 = vmatprep.mubr.msk.f32.mxu1 %vm533_vm1, %v1207_v44 }
  0xa2   : > { %v396_v45 = vpop.permute.xlu1 %395  ;;  %1388 = vmatmul.mubr.msk.f32.vlgmr.msra.gmra.mrb[0].mxu1 %vm533_vm1, %v1208_v43  ;;  %v348_v46 = vpop.permute.xlu0 %347  ;;  %v284_v43 = vld [vmem:[%s261_s13] sm:$0x3] }
  0xa3   : > { %vm454_vm6 = vcmp.eq.s32.totalorder %v396_v45, %v1681_v35  ;;  %vm438_vm7 = vcmp.eq.s32.totalorder %v348_v46, %v1681_v35  ;;  %v294_v44 = vrot.slane %v284_v43, %v293_v42 }
  0xa4   : > { %v1209_v47 = vsel %vm454_vm6, 1.0, %v1553_v38  ;;  %v1193_v48 = vsel %vm438_vm7, 1.0, %v1553_v38 }
  0xa5   : > { %1366 = vmatprep.mubr.msk.f32.mxu0 %vm533_vm1, %v1193_v48  ;;  %1390 = vmatprep.mubr.msk.f32.mxu1 %vm533_vm1, %v1209_v47 }
  0xa6   : > { %v399_v49 = vpop.permute.xlu1 %398  ;;  %v351_v50 = vpop.permute.xlu0 %350 }
  0xa7   : > { %vm455_vm8 = vcmp.eq.s32.totalorder %v399_v49, %v1681_v35  ;;  %vm439_vm9 = vcmp.eq.s32.totalorder %v351_v50, %v1681_v35 }
  0xa8   : > { %v1210_v51 = vsel %vm455_vm8, 1.0, %v1553_v38  ;;  %v1194_v52 = vsel %vm439_vm9, 1.0, %v1553_v38 }
  0xa9   : > { %1367 = vmatmul.mubr.msk.f32.gmra.mrb[2].mxu0 %vm533_vm1, %v1194_v52  ;;  %1391 = vmatmul.mubr.msk.f32.gmra.mrb[2].mxu1 %vm533_vm1, %v1210_v51 }
  0xaa   : > { %v402_v53 = vpop.permute.xlu1 %401  ;;  %v354_v54 = vpop.permute.xlu0 %353 }
  0xab   : > { %vm456_vm10 = vcmp.eq.s32.totalorder %v402_v53, %v1681_v35  ;;  %vm440_vm11 = vcmp.eq.s32.totalorder %v354_v54, %v1681_v35 }
  0xac   : > { %v1211_v55 = vsel %vm456_vm10, 1.0, %v1553_v38  ;;  %v1195_v56 = vsel %vm440_vm11, 1.0, %v1553_v38 }
  0xad   : > { %1369 = vmatprep.mubr.msk.f32.mxu0 %vm533_vm1, %v1195_v56  ;;  %1393 = vmatprep.mubr.msk.f32.mxu1 %vm533_vm1, %v1211_v55 }
  0xae   : > { %v405_v57 = vpop.permute.xlu1 %404  ;;  %v357_v58 = vpop.permute.xlu0 %356 }
  0xaf   : > { %vm457_vm12 = vcmp.eq.s32.totalorder %v405_v57, %v1681_v35  ;;  %vm441_vm13 = vcmp.eq.s32.totalorder %v357_v58, %v1681_v35 }
  0xb0   : > { %v1212_v59 = vsel %vm457_vm12, 1.0, %v1553_v38  ;;  %v1196_v60 = vsel %vm441_vm13, 1.0, %v1553_v38 }
  0xb1   : > { %1370 = vmatmul.mubr.msk.f32.gmra.mrb[4].mxu0 %vm533_vm1, %v1196_v60  ;;  %1394 = vmatmul.mubr.msk.f32.gmra.mrb[4].mxu1 %vm533_vm1, %v1212_v59 }
  0xb2   : > { %v408_v61 = vpop.permute.xlu1 %407  ;;  %v360_v62 = vpop.permute.xlu0 %359 }
  0xb3   : > { %vm458_vm14 = vcmp.eq.s32.totalorder %v408_v61, %v1681_v35  ;;  %vm442_vm15 = vcmp.eq.s32.totalorder %v360_v62, %v1681_v35 }
  0xb4   : > { %v1213_v63 = vsel %vm458_vm14, 1.0, %v1553_v38  ;;  %v1197_v0 = vsel %vm442_vm15, 1.0, %v1553_v38 }
  0xb5   : > { %1372 = vmatprep.mubr.msk.f32.mxu0 %vm533_vm1, %v1197_v0  ;;  %1396 = vmatprep.mubr.msk.f32.mxu1 %vm533_vm1, %v1213_v63 }
  0xb6   : > { %v411_v1 = vpop.permute.xlu1 %410  ;;  %v363_v2 = vpop.permute.xlu0 %362 }
  0xb7   : > { %vm459_vm0 = vcmp.eq.s32.totalorder %v411_v1, %v1681_v35  ;;  %vm443_vm2 = vcmp.eq.s32.totalorder %v363_v2, %v1681_v35 }
  0xb8   : > { %v1214_v3 = vsel %vm459_vm0, 1.0, %v1553_v38  ;;  %v1198_v4 = vsel %vm443_vm2, 1.0, %v1553_v38 }
  0xb9   : > { %1373 = vmatmul.mubr.msk.f32.gmra.mrb[6].mxu0 %vm533_vm1, %v1198_v4  ;;  %1397 = vmatmul.mubr.msk.f32.gmra.mrb[6].mxu1 %vm533_vm1, %v1214_v3 }
  0xba   : > { %v414_v5 = vpop.permute.xlu1 %413  ;;  %v366_v6 = vpop.permute.xlu0 %365 }
  0xbb   : > { %vm460_vm3 = vcmp.eq.s32.totalorder %v414_v5, %v1681_v35  ;;  %vm444_vm4 = vcmp.eq.s32.totalorder %v366_v6, %v1681_v35 }
  0xbc   : > { %v1215_v7 = vsel %vm460_vm3, 1.0, %v1553_v38  ;;  %v1199_v8 = vsel %vm444_vm4, 1.0, %v1553_v38 }
  0xbd   : > { %1375 = vmatprep.mubr.msk.f32.mxu0 %vm533_vm1, %v1199_v8  ;;  %1399 = vmatprep.mubr.msk.f32.mxu1 %vm533_vm1, %v1215_v7 }
  0xbe   : > { %v417_v9 = vpop.permute.xlu1 %416  ;;  %v369_v10 = vpop.permute.xlu0 %368 }
  0xbf   : > { %vm461_vm5 = vcmp.eq.s32.totalorder %v417_v9, %v1681_v35  ;;  %vm445_vm6 = vcmp.eq.s32.totalorder %v369_v10, %v1681_v35 }
  0xc0   : > { %v1216_v11 = vsel %vm461_vm5, 1.0, %v1553_v38  ;;  %v1200_v12 = vsel %vm445_vm6, 1.0, %v1553_v38  ;;  %vm296_vm5 = vcmp.eq.s32.totalorder %v294_v44, %v286_v40 }
  0xc1   : > { %1376 = vmatmul.mubr.msk.f32.gmra.mrb[8].mxu0 %vm533_vm1, %v1200_v12  ;;  %1400 = vmatmul.mubr.msk.f32.gmra.mrb[8].mxu1 %vm533_vm1, %v1216_v11  ;;  %v1190_v46 = vsel %vm296_vm5, 1.0, %v1553_v38 }
  0xc2   : > { %v420_v13 = vpop.permute.xlu1 %419  ;;  %v372_v14 = vpop.permute.xlu0 %371 }
  0xc3   : > { %vm462_vm7 = vcmp.eq.s32.totalorder %v420_v13, %v1681_v35  ;;  %vm446_vm8 = vcmp.eq.s32.totalorder %v372_v14, %v1681_v35 }
  0xc4   : > { %v1217_v15 = vsel %vm462_vm7, 1.0, %v1553_v38  ;;  %v1201_v16 = vsel %vm446_vm8, 1.0, %v1553_v38 }
  0xc5   : > { %1378 = vmatprep.mubr.msk.f32.mxu0 %vm533_vm1, %v1201_v16  ;;  %1402 = vmatprep.mubr.msk.f32.mxu1 %vm533_vm1, %v1217_v15 }
  0xc6   : > { %v423_v17 = vpop.permute.xlu1 %422  ;;  %v375_v18 = vpop.permute.xlu0 %374 }
  0xc7   : > { %vm463_vm9 = vcmp.eq.s32.totalorder %v423_v17, %v1681_v35  ;;  %vm447_vm10 = vcmp.eq.s32.totalorder %v375_v18, %v1681_v35 }
  0xc8   : > { %v1218_v19 = vsel %vm463_vm9, 1.0, %v1553_v38  ;;  %v1202_v20 = vsel %vm447_vm10, 1.0, %v1553_v38 }
  0xc9   : > { %1379 = vmatmul.mubr.msk.f32.gmra.mrb[10].mxu0 %vm533_vm1, %v1202_v20  ;;  %1403 = vmatmul.mubr.msk.f32.gmra.mrb[10].mxu1 %vm533_vm1, %v1218_v19 }
  0xca   : > { %v426_v21 = vpop.permute.xlu1 %425  ;;  %v378_v22 = vpop.permute.xlu0 %377 }
  0xcb   : > { %vm464_vm11 = vcmp.eq.s32.totalorder %v426_v21, %v1681_v35  ;;  %vm448_vm12 = vcmp.eq.s32.totalorder %v378_v22, %v1681_v35 }
  0xcc   : > { %v1219_v23 = vsel %vm464_vm11, 1.0, %v1553_v38  ;;  %v1203_v24 = vsel %vm448_vm12, 1.0, %v1553_v38 }
  0xcd   : > { %1381 = vmatprep.mubr.msk.f32.mxu0 %vm533_vm1, %v1203_v24  ;;  %1405 = vmatprep.mubr.msk.f32.mxu1 %vm533_vm1, %v1219_v23 }
  0xce   : > { %v429_v25 = vpop.permute.xlu1 %428  ;;  %v381_v26 = vpop.permute.xlu0 %380 }
  0xcf   : > { %vm465_vm13 = vcmp.eq.s32.totalorder %v429_v25, %v1681_v35  ;;  %vm449_vm14 = vcmp.eq.s32.totalorder %v381_v26, %v1681_v35 }
  0xd0   : > { %v1220_v27 = vsel %vm465_vm13, 1.0, %v1553_v38  ;;  %v1204_v28 = vsel %vm449_vm14, 1.0, %v1553_v38 }
  0xd1   : > { %1382 = vmatmul.mubr.msk.f32.gmra.mrb[12].mxu0 %vm533_vm1, %v1204_v28  ;;  %1406 = vmatmul.mubr.msk.f32.gmra.mrb[12].mxu1 %vm533_vm1, %v1220_v27 }
  0xd2   : > { %v432_v29 = vpop.permute.xlu1 %431  ;;  %v384_v30 = vpop.permute.xlu0 %383 }
  0xd3   : > { %vm466_vm15 = vcmp.eq.s32.totalorder %v432_v29, %v1681_v35  ;;  %vm450_vm0 = vcmp.eq.s32.totalorder %v384_v30, %v1681_v35 }
  0xd4   : > { %v1221_v31 = vsel %vm466_vm15, 1.0, %v1553_v38  ;;  %v1205_v32 = vsel %vm450_vm0, 1.0, %v1553_v38 }
  0xd5   : > { %1384 = vmatprep.mubr.msk.f32.mxu0 %vm533_vm1, %v1205_v32  ;;  %1408 = vmatprep.mubr.msk.f32.mxu1 %vm533_vm1, %v1221_v31 }
  0xd6   : > { %v435_v33 = vpop.permute.xlu1 %434  ;;  %v387_v36 = vpop.permute.xlu0 %386 }
  0xd7   : > { %vm467_vm2 = vcmp.eq.s32.totalorder %v435_v33, %v1681_v35  ;;  %vm451_vm3 = vcmp.eq.s32.totalorder %v387_v36, %v1681_v35  ;;  %v290_v35 = vrot.slane %v284_v43, %v289_v41 }
  0xd8   : > { %v1222_v37 = vsel %vm467_vm2, 1.0, %v1553_v38  ;;  %v1206_v39 = vsel %vm451_vm3, 1.0, %v1553_v38 }
  0xd9   : > { %1385 = vmatmul.mubr.msk.f32.gmra.mrb[14].mxu0 %vm533_vm1, %v1206_v39  ;;  %1409 = vmatmul.mubr.msk.f32.gmra.mrb[14].mxu1 %vm533_vm1, %v1222_v37  ;;  %vm295_vm4 = vcmp.eq.s32.totalorder %v290_v35, %v286_v40 }
  0xda   : > { %v1189_v45 = vsel %vm295_vm4, 1.0, %v1553_v38 }
  0xdb   : > { %v303_v34 = vcombine.low %v1189_v45, %v1190_v46 }
  0xdd   : > { %305 = vst [vmem:[%s242_s24] sm:$0xff] %v303_v34 }
  0xde   : > { %1485 = shalt.err (!%p1482_p5)
}
  0xdf   : > { %s1486_s18 = scalar_lea.hbm %s1791_s6, 128  ;;  %s1490_s14 = scalar_lea.hbm %s1905_s3, 256 }
  0xe0   : > { %p1487_p6 = scmp.ne.s32.totalorder %s1791_s6, %s1486_s18  ;;  %p1491_p10 = scmp.lt.u32.totalorder %s1791_s6, %s1905_s3 }
  0xe1   : > { %p1492_p11 = scmp.lt.u32.totalorder %s1490_s14, %s1486_s18  ;;  %p1494_p13 = scmp.lt.u32.totalorder %s1486_s18, %s1791_s6 }
  0xe2   : > { %p1488_p7 = pnand %p1487_p6, %p1620_p4 }
  0xe3   : > { %p1493_p12 = por %p1492_p11, %p1491_p10 }
  0xe4   : > { %p1489_p9 = pneg %p1488_p7 }
  0xe5   : > { %p1495_p0 = por %p1494_p13, %p1493_p12 }
  0xe7   : > { %p1496_p1 = pnand %p1495_p0, %p1489_p9 }
  0xe9   : > { %1499 = shalt.err (!%p1496_p1)
}
  0xea   : > { %1413 = dma.vmem_to_hbm [thread:$0]  (%p1620_p4), %s1047_s26, 128, %s1791_s6, %s1021_s7   ;;  %vm987_vm1 = vcmask 257024  }
  0xeb   : > { %s1294_s24 = sshll.u32 %s1637_s29, 7 }
  0xec   : > { %s1814_s8 = scalar_lea.vmem %s1906_s4, %s1294_s24 }
 0x171   : > { %v1365_v38 = vpop.f32.mrb[0].mxu0 }
 0x172   : > { %v1296_v47 = vpack.c.bf16 %v1365_v38, %v1365_v38  ;;  %v700_v48 = vpop.f32.mrb[1].mxu0 }
 0x173   : > { %v1295_v49 = vpack.c.bf16 %v700_v48, %v700_v48 }
 0x174   : > { %989 = vst.msk [vmem:[%s1814_s8 + $0x4] sm:$0xf] %vm987_vm1, %v1296_v47 }
 0x175   : > { %988 = vst.msk [vmem:[%s1814_s8] sm:$0xf] %vm987_vm1, %v1295_v49  ;;  %v1389_v50 = vpop.f32.mrb[0].mxu1 }
 0x176   : > { %v1312_v51 = vpack.c.bf16 %v1389_v50, %v1389_v50  ;;  %v780_v52 = vpop.f32.mrb[1].mxu1 }
 0x177   : > { %v1311_v53 = vpack.c.bf16 %v780_v52, %v780_v52 }
 0x178   : > { %1005 = vst.msk [vmem:[%s1814_s8 + $0x44] sm:$0xf] %vm987_vm1, %v1312_v51 }
 0x179   : > { %1004 = vst.msk [vmem:[%s1814_s8 + $0x40] sm:$0xf] %vm987_vm1, %v1311_v53 }
 0x17c   : > { %v1368_v54 = vpop.f32.mrb[2].mxu0  ;;  %v1392_v55 = vpop.f32.mrb[2].mxu1 }
 0x17d   : > { %v1298_v56 = vpack.c.bf16 %v1368_v54, %v1368_v54  ;;  %v1314_v57 = vpack.c.bf16 %v1392_v55, %v1392_v55  ;;  %v710_v58 = vpop.f32.mrb[3].mxu0  ;;  %v790_v59 = vpop.f32.mrb[3].mxu1 }
 0x17e   : > { %v1297_v60 = vpack.c.bf16 %v710_v58, %v710_v58  ;;  %v1313_v61 = vpack.c.bf16 %v790_v59, %v790_v59 }
 0x17f   : > { %991 = vst.msk [vmem:[%s1814_s8 + $0xc] sm:$0xf] %vm987_vm1, %v1298_v56  ;;  %1007 = vst.msk [vmem:[%s1814_s8 + $0x4c] sm:$0xf] %vm987_vm1, %v1314_v57 }
 0x180   : > { %990 = vst.msk [vmem:[%s1814_s8 + $0x8] sm:$0xf] %vm987_vm1, %v1297_v60  ;;  %1006 = vst.msk [vmem:[%s1814_s8 + $0x48] sm:$0xf] %vm987_vm1, %v1313_v61 }
 0x184   : > { %v1371_v62 = vpop.f32.mrb[4].mxu0  ;;  %v1395_v63 = vpop.f32.mrb[4].mxu1 }
 0x185   : > { %v1300_v0 = vpack.c.bf16 %v1371_v62, %v1371_v62  ;;  %v1316_v1 = vpack.c.bf16 %v1395_v63, %v1395_v63  ;;  %v720_v2 = vpop.f32.mrb[5].mxu0  ;;  %v800_v3 = vpop.f32.mrb[5].mxu1 }
 0x186   : > { %v1299_v4 = vpack.c.bf16 %v720_v2, %v720_v2  ;;  %v1315_v5 = vpack.c.bf16 %v800_v3, %v800_v3 }
 0x187   : > { %993 = vst.msk [vmem:[%s1814_s8 + $0x14] sm:$0xf] %vm987_vm1, %v1300_v0  ;;  %1009 = vst.msk [vmem:[%s1814_s8 + $0x54] sm:$0xf] %vm987_vm1, %v1316_v1 }
 0x188   : > { %992 = vst.msk [vmem:[%s1814_s8 + $0x10] sm:$0xf] %vm987_vm1, %v1299_v4  ;;  %1008 = vst.msk [vmem:[%s1814_s8 + $0x50] sm:$0xf] %vm987_vm1, %v1315_v5 }
 0x18c   : > { %v1374_v6 = vpop.f32.mrb[6].mxu0  ;;  %v1398_v7 = vpop.f32.mrb[6].mxu1 }
 0x18d   : > { %v1302_v8 = vpack.c.bf16 %v1374_v6, %v1374_v6  ;;  %v1318_v9 = vpack.c.bf16 %v1398_v7, %v1398_v7  ;;  %v730_v10 = vpop.f32.mrb[7].mxu0  ;;  %v810_v11 = vpop.f32.mrb[7].mxu1 }
 0x18e   : > { %v1301_v12 = vpack.c.bf16 %v730_v10, %v730_v10  ;;  %v1317_v13 = vpack.c.bf16 %v810_v11, %v810_v11 }
 0x18f   : > { %995 = vst.msk [vmem:[%s1814_s8 + $0x1c] sm:$0xf] %vm987_vm1, %v1302_v8  ;;  %1011 = vst.msk [vmem:[%s1814_s8 + $0x5c] sm:$0xf] %vm987_vm1, %v1318_v9 }
 0x190   : > { %994 = vst.msk [vmem:[%s1814_s8 + $0x18] sm:$0xf] %vm987_vm1, %v1301_v12  ;;  %1010 = vst.msk [vmem:[%s1814_s8 + $0x58] sm:$0xf] %vm987_vm1, %v1317_v13 }
 0x194   : > { %v1377_v14 = vpop.f32.mrb[8].mxu0  ;;  %v1401_v15 = vpop.f32.mrb[8].mxu1 }
 0x195   : > { %v1304_v16 = vpack.c.bf16 %v1377_v14, %v1377_v14  ;;  %v1320_v17 = vpack.c.bf16 %v1401_v15, %v1401_v15  ;;  %v740_v18 = vpop.f32.mrb[9].mxu0  ;;  %v820_v19 = vpop.f32.mrb[9].mxu1 }
 0x196   : > { %v1303_v20 = vpack.c.bf16 %v740_v18, %v740_v18  ;;  %v1319_v21 = vpack.c.bf16 %v820_v19, %v820_v19 }
 0x197   : > { %997 = vst.msk [vmem:[%s1814_s8 + $0x24] sm:$0xf] %vm987_vm1, %v1304_v16  ;;  %1013 = vst.msk [vmem:[%s1814_s8 + $0x64] sm:$0xf] %vm987_vm1, %v1320_v17 }
 0x198   : > { %996 = vst.msk [vmem:[%s1814_s8 + $0x20] sm:$0xf] %vm987_vm1, %v1303_v20  ;;  %1012 = vst.msk [vmem:[%s1814_s8 + $0x60] sm:$0xf] %vm987_vm1, %v1319_v21 }
 0x19c   : > { %v1380_v22 = vpop.f32.mrb[10].mxu0  ;;  %v1404_v23 = vpop.f32.mrb[10].mxu1 }
 0x19d   : > { %v1306_v24 = vpack.c.bf16 %v1380_v22, %v1380_v22  ;;  %v1322_v25 = vpack.c.bf16 %v1404_v23, %v1404_v23  ;;  %v750_v26 = vpop.f32.mrb[11].mxu0  ;;  %v830_v27 = vpop.f32.mrb[11].mxu1 }
 0x19e   : > { %v1305_v28 = vpack.c.bf16 %v750_v26, %v750_v26  ;;  %v1321_v29 = vpack.c.bf16 %v830_v27, %v830_v27 }
 0x19f   : > { %999 = vst.msk [vmem:[%s1814_s8 + $0x2c] sm:$0xf] %vm987_vm1, %v1306_v24  ;;  %1015 = vst.msk [vmem:[%s1814_s8 + $0x6c] sm:$0xf] %vm987_vm1, %v1322_v25 }
 0x1a0   : > { %998 = vst.msk [vmem:[%s1814_s8 + $0x28] sm:$0xf] %vm987_vm1, %v1305_v28  ;;  %1014 = vst.msk [vmem:[%s1814_s8 + $0x68] sm:$0xf] %vm987_vm1, %v1321_v29 }
 0x1a4   : > { %v1383_v30 = vpop.f32.mrb[12].mxu0  ;;  %v1407_v31 = vpop.f32.mrb[12].mxu1 }
 0x1a5   : > { %v1308_v32 = vpack.c.bf16 %v1383_v30, %v1383_v30  ;;  %v1324_v33 = vpack.c.bf16 %v1407_v31, %v1407_v31  ;;  %v760_v36 = vpop.f32.mrb[13].mxu0  ;;  %v840_v37 = vpop.f32.mrb[13].mxu1 }
 0x1a6   : > { %v1307_v39 = vpack.c.bf16 %v760_v36, %v760_v36  ;;  %v1323_v40 = vpack.c.bf16 %v840_v37, %v840_v37 }
 0x1a7   : > { %1001 = vst.msk [vmem:[%s1814_s8 + $0x34] sm:$0xf] %vm987_vm1, %v1308_v32  ;;  %1017 = vst.msk [vmem:[%s1814_s8 + $0x74] sm:$0xf] %vm987_vm1, %v1324_v33 }
 0x1a8   : > { %1000 = vst.msk [vmem:[%s1814_s8 + $0x30] sm:$0xf] %vm987_vm1, %v1307_v39  ;;  %1016 = vst.msk [vmem:[%s1814_s8 + $0x70] sm:$0xf] %vm987_vm1, %v1323_v40 }
 0x1ac   : > { %v1386_v41 = vpop.f32.mrb[14].mxu0  ;;  %v1410_v42 = vpop.f32.mrb[14].mxu1 }
 0x1ad   : > { %v1310_v43 = vpack.c.bf16 %v1386_v41, %v1386_v41  ;;  %v1326_v35 = vpack.c.bf16 %v1410_v42, %v1410_v42  ;;  %v770_v44 = vpop.f32.mrb[15].mxu0  ;;  %v850_v45 = vpop.f32.mrb[15].mxu1 }
 0x1ae   : > { %v1309_v46 = vpack.c.bf16 %v770_v44, %v770_v44  ;;  %v1325_v34 = vpack.c.bf16 %v850_v45, %v850_v45 }
 0x1af   : > { %1003 = vst.msk [vmem:[%s1814_s8 + $0x3c] sm:$0xf] %vm987_vm1, %v1310_v43  ;;  %1019 = vst.msk [vmem:[%s1814_s8 + $0x7c] sm:$0xf] %vm987_vm1, %v1326_v35 }
 0x1b0   : > { %1002 = vst.msk [vmem:[%s1814_s8 + $0x38] sm:$0xf] %vm987_vm1, %v1309_v46  ;;  %1018 = vst.msk [vmem:[%s1814_s8 + $0x78] sm:$0xf] %vm987_vm1, %v1325_v34 }
 0x1b1 PF: > { %p1419_p4 = scmp.ge.s32.totalorder %s1550_s20, 2  ;;  %s1062_s25 = sand.u32 1, %s1530_s15  }
 0x1b2   : > { %s1063_s29 = scalar_lea.sflag [#allocation3], %s1062_s25 }
 0x1b3   : > { %p1416_p2 = pnand %p1419_p4, %p1627_p8 }
 0x1b5   : > { %1525 = dma.done.wait (!%p1416_p2), %s1063_s29, 128  }
 0x1b6   : > { %1527 = vsyncadd (!%p1416_p2), %s1063_s29, 4294967168  ;;  %s18_s20 = sadd.s32 1, %s1550_s20   ;;  %s1909_s15 = smov %s1534_s16 }
 0x1b7   : > { %p15_p3 = scmp.ge.s32.totalorder %s18_s20, 4   ;;  %s1910_s16 = smov %s1538_s17 }
 0x1b8   : > { %s1911_s17 = smov %s1633_s28  ;;  %s1912_s18 = smov %s1546_s19 }
 0x1b9   : > { %s1913_s19 = smov %s1915_s23  ;;  %17 = sbr.rel (!%p15_p3) target bundleno = 4 (0x4), region = 82 }
 0x1c0   :  { %1080 = vsyncpa [#allocation3], 1 }
 0x1c1   :  { %1082 = vsyncpa [#allocation3 + $0x1], 1 }

</bundles_post_ra>
